<compile_context>
chip_gen: v7x
topology: tpu7x:2x2x1
jax: 0.10.0
libtpu: 0.0.40
codegen_flags: <defaults>
</compile_context>

<pallas_src>
import functools

import jax
import jax.numpy as jnp
from jax.experimental import pallas as pl
from jax.experimental.pallas import tpu as pltpu


_EPS = 1e-5
_LANE = 128


def _round_up(x, m):
    return ((x + m - 1) // m) * m


def _actor_kernel(x_ref, w1_ref, w2_ref, w3_ref, p_ref, o_ref):
    """Whole forward pass in VMEM.  All shapes are (8,128)-aligned."""
    Hp = w1_ref.shape[1]
    Ap = w3_ref.shape[1]

    # Packed parameter slab rows: 0=b1, 1=gamma, 2=beta, 3=b2, 4=b3 (padded).
    b1 = p_ref[0:1, 0:Hp]
    gamma = p_ref[1:2, 0:Hp]
    beta = p_ref[2:3, 0:Hp]
    b2 = p_ref[3:4, 0:Hp]
    b3 = p_ref[4:5, 0:Ap]

    # fc1 + ReLU (bf16 MXU, f32 accumulation)
    x = x_ref[...].astype(jnp.bfloat16)
    h1 = jnp.dot(x, w1_ref[...], preferred_element_type=jnp.float32) + b1
    h1 = jnp.maximum(h1, 0.0)

    # BatchNorm1d, training-mode batch stats, single reduction pass.
    inv_b = 1.0 / float(x_ref.shape[0])
    s1 = jnp.sum(h1, axis=0, keepdims=True)
    s2 = jnp.sum(h1 * h1, axis=0, keepdims=True)
    mean = s1 * inv_b
    var = jnp.maximum(s2 * inv_b - mean * mean, 0.0)   # biased variance
    inv_std = jax.lax.rsqrt(var + _EPS)
    h1 = (h1 - mean) * (inv_std * gamma) + beta

    # fc2 + ReLU
    h2 = jnp.dot(h1.astype(jnp.bfloat16), w2_ref[...],
                 preferred_element_type=jnp.float32) + b2
    h2 = jnp.maximum(h2, 0.0)

    # fc3 + tanh
    out = jnp.dot(h2.astype(jnp.bfloat16), w3_ref[...],
                  preferred_element_type=jnp.float32) + b3
    o_ref[...] = jnp.tanh(out).astype(o_ref.dtype)


@functools.partial(jax.jit, static_argnames=("action_size",))
def actor_forward(state, w1p, w2p, w3p, p_slab, *, action_size):
    """state: (B, state_size) f32.  w*p: padded bf16 weights.  p_slab: (8, P) f32."""
    B, S = state.shape
    Sp = w1p.shape[0]
    Ap = w3p.shape[1]
    x = state if S == Sp else jnp.pad(state, ((0, 0), (0, Sp - S)))

    vmem_spec = pl.BlockSpec(memory_space=pltpu.MemorySpace.VMEM)
    out = pl.pallas_call(
        _actor_kernel,
        out_shape=jax.ShapeDtypeStruct((B, Ap), jnp.float32),
        in_specs=[vmem_spec] * 5,
        out_specs=vmem_spec,
    )(x, w1p, w2p, w3p, p_slab)
    return out[:, :action_size]


def init_params(key, state_size, action_size, hidden_units):
    """f32 parameters mirroring ActorNetwork.__init__ / reset_parameters.

    Linear weights are stored as (in_features, out_features) (transposed vs.
    PyTorch), so forward is `x @ W + b`.
    """
    k = jax.random.split(key, 6)
    # hidden_init uses weight.size()[0] == out_features in PyTorch layout.
    lim1 = 1.0 / jnp.sqrt(jnp.float32(hidden_units))
    lim2 = 1.0 / jnp.sqrt(jnp.float32(hidden_units))
    lim3 = 0.003
    # biases keep nn.Linear default: U(-1/sqrt(fan_in), 1/sqrt(fan_in))
    blim1 = 1.0 / jnp.sqrt(jnp.float32(state_size))
    blim2 = 1.0 / jnp.sqrt(jnp.float32(hidden_units))
    blim3 = 1.0 / jnp.sqrt(jnp.float32(hidden_units))

    w1 = jax.random.uniform(k[0], (state_size, hidden_units), jnp.float32, -lim1, lim1)
    b1 = jax.random.uniform(k[1], (hidden_units,), jnp.float32, -blim1, blim1)
    w2 = jax.random.uniform(k[2], (hidden_units, hidden_units), jnp.float32, -lim2, lim2)
    b2 = jax.random.uniform(k[3], (hidden_units,), jnp.float32, -blim2, blim2)
    w3 = jax.random.uniform(k[4], (hidden_units, action_size), jnp.float32, -lim3, lim3)
    b3 = jax.random.uniform(k[5], (action_size,), jnp.float32, -blim3, blim3)
    gamma = jnp.ones((hidden_units,), jnp.float32)    # bn1.weight
    beta = jnp.zeros((hidden_units,), jnp.float32)    # bn1.bias
    return w1, b1, gamma, beta, w2, b2, w3, b3


def pack_params(params, state_size, action_size, hidden_units):
    """Pad weights to 128-multiples (bf16) and pack the five bias/BN rows into
    one (8, P) f32 slab (rows 5..7 are zero padding for sublane alignment)."""
    w1, b1, gamma, beta, w2, b2, w3, b3 = params
    Sp = _round_up(state_size, _LANE)
    Hp = _round_up(hidden_units, _LANE)
    Ap = _round_up(action_size, _LANE)
    P = max(Hp, Ap)

    w1p = jnp.zeros((Sp, Hp), jnp.float32).at[:state_size, :hidden_units].set(w1)
    w2p = jnp.zeros((Hp, Hp), jnp.float32).at[:hidden_units, :hidden_units].set(w2)
    w3p = jnp.zeros((Hp, Ap), jnp.float32).at[:hidden_units, :action_size].set(w3)

    slab = jnp.zeros((8, P), jnp.float32)
    slab = slab.at[0, :hidden_units].set(b1)
    slab = slab.at[1, :hidden_units].set(gamma)
    slab = slab.at[2, :hidden_units].set(beta)
    slab = slab.at[3, :hidden_units].set(b2)
    slab = slab.at[4, :action_size].set(b3)

    return (w1p.astype(jnp.bfloat16), w2p.astype(jnp.bfloat16),
            w3p.astype(jnp.bfloat16), slab)


def _reference_forward(state, params):
    """Pure-JAX f32 reference with PyTorch forward semantics."""
    w1, b1, gamma, beta, w2, b2, w3, b3 = params
    h1 = jnp.maximum(state @ w1 + b1, 0.0)
    mean = jnp.mean(h1, axis=0, keepdims=True)
    var = jnp.mean((h1 - mean) ** 2, axis=0, keepdims=True)
    h1 = (h1 - mean) / jnp.sqrt(var + _EPS) * gamma + beta
    h2 = jnp.maximum(h1 @ w2 + b2, 0.0)
    return jnp.tanh(h2 @ w3 + b3)


if __name__ == "__main__":
    batch = 8
    state_size = 16
    action_size = 4
    hidden_units = 128   # module default; already lane-dense

    key = jax.random.PRNGKey(0)
    k_state, k_params = jax.random.split(key)

    state = jax.random.normal(k_state, (batch, state_size), jnp.float32)
    params = init_params(k_params, state_size, action_size, hidden_units)
    w1p, w2p, w3p, p_slab = pack_params(params, state_size, action_size, hidden_units)

    out = actor_forward(state, w1p, w2p, w3p, p_slab, action_size=action_size)
    out = jax.block_until_ready(out)

    ref = _reference_forward(state, params)
    assert out.shape == (batch, action_size)
    assert out.dtype == jnp.float32
    # bf16 matmul inputs (f32 accumulation) vs. pure-f32 reference -> loose tol.
    assert jnp.allclose(out, ref, atol=2e-2, rtol=2e-2), "mismatch vs reference"

    print("KERNEL_OK")
</pallas_src>

<mosaic_0001>
module attributes {stable_mosaic.version = 11 : i64} {
  func.func @_actor_kernel(%arg0: memref<8x128xf32, #tpu.memory_space<vmem>>, %arg1: memref<128x128xbf16, #tpu.memory_space<vmem>>, %arg2: memref<128x128xbf16, #tpu.memory_space<vmem>>, %arg3: memref<128x128xbf16, #tpu.memory_space<vmem>>, %arg4: memref<8x128xf32, #tpu.memory_space<vmem>>, %arg5: memref<8x128xf32, #tpu.memory_space<vmem>>) attributes {dimension_semantics = [], scalar_prefetch = 0 : i64, scratch_operands = 0 : i64, tpu.core_type = #tpu.core_type<tc>} {
    %c0 = arith.constant 0 : index
    %c0_0 = arith.constant 0 : index
    %0 = vector.load %arg4[%c0, %c0_0] : memref<8x128xf32, #tpu.memory_space<vmem>>, vector<1x128xf32>
    %c1 = arith.constant 1 : index
    %c0_1 = arith.constant 0 : index
    %1 = vector.load %arg4[%c1, %c0_1] : memref<8x128xf32, #tpu.memory_space<vmem>>, vector<1x128xf32>
    %c2 = arith.constant 2 : index
    %c0_2 = arith.constant 0 : index
    %2 = vector.load %arg4[%c2, %c0_2] : memref<8x128xf32, #tpu.memory_space<vmem>>, vector<1x128xf32>
    %c3 = arith.constant 3 : index
    %c0_3 = arith.constant 0 : index
    %3 = vector.load %arg4[%c3, %c0_3] : memref<8x128xf32, #tpu.memory_space<vmem>>, vector<1x128xf32>
    %c4 = arith.constant 4 : index
    %c0_4 = arith.constant 0 : index
    %4 = vector.load %arg4[%c4, %c0_4] : memref<8x128xf32, #tpu.memory_space<vmem>>, vector<1x128xf32>
    %c0_5 = arith.constant 0 : index
    %c0_6 = arith.constant 0 : index
    %5 = vector.load %arg0[%c0_5, %c0_6] : memref<8x128xf32, #tpu.memory_space<vmem>>, vector<8x128xf32>
    %6 = arith.truncf %5 : vector<8x128xf32> to vector<8x128xbf16>
    %c0_7 = arith.constant 0 : index
    %c0_8 = arith.constant 0 : index
    %7 = vector.load %arg1[%c0_7, %c0_8] : memref<128x128xbf16, #tpu.memory_space<vmem>>, vector<128x128xbf16>
    %cst = arith.constant dense<0.000000e+00> : vector<8x128xf32>
    %8 = tpu.matmul %6, %7, %cst {dimension_numbers = #tpu.dot_dimension_numbers<[1], [0], [0], [1], [0, 0, 1, 1], [], []>} : vector<8x128xbf16>, vector<128x128xbf16>, vector<8x128xf32> -> vector<8x128xf32>
    %9 = vector.broadcast %0 : vector<1x128xf32> to vector<8x128xf32>
    %10 = arith.addf %8, %9 : vector<8x128xf32>
    %cst_9 = arith.constant 0.000000e+00 : f32
    %11 = vector.broadcast %cst_9 : f32 to vector<8x128xf32>
    %12 = arith.maximumf %10, %11 : vector<8x128xf32>
    %cst_10 = arith.constant dense<0.000000e+00> : vector<128xf32>
    %13 = vector.multi_reduction <add>, %12, %cst_10 [0] : vector<8x128xf32> to vector<128xf32>
    %14 = vector.shape_cast %13 : vector<128xf32> to vector<1x128xf32>
    %15 = arith.mulf %12, %12 : vector<8x128xf32>
    %cst_11 = arith.constant dense<0.000000e+00> : vector<128xf32>
    %16 = vector.multi_reduction <add>, %15, %cst_11 [0] : vector<8x128xf32> to vector<128xf32>
    %17 = vector.shape_cast %16 : vector<128xf32> to vector<1x128xf32>
    %cst_12 = arith.constant 1.250000e-01 : f32
    %18 = vector.broadcast %cst_12 : f32 to vector<1x128xf32>
    %19 = arith.mulf %14, %18 : vector<1x128xf32>
    %cst_13 = arith.constant 1.250000e-01 : f32
    %20 = vector.broadcast %cst_13 : f32 to vector<1x128xf32>
    %21 = arith.mulf %17, %20 : vector<1x128xf32>
    %22 = arith.mulf %19, %19 : vector<1x128xf32>
    %23 = arith.subf %21, %22 : vector<1x128xf32>
    %cst_14 = arith.constant 0.000000e+00 : f32
    %24 = vector.broadcast %cst_14 : f32 to vector<1x128xf32>
    %25 = arith.maximumf %23, %24 : vector<1x128xf32>
    %cst_15 = arith.constant 9.99999974E-6 : f32
    %26 = vector.broadcast %cst_15 : f32 to vector<1x128xf32>
    %27 = arith.addf %25, %26 : vector<1x128xf32>
    %28 = math.rsqrt %27 : vector<1x128xf32>
    %29 = vector.broadcast %19 : vector<1x128xf32> to vector<8x128xf32>
    %30 = arith.subf %12, %29 : vector<8x128xf32>
    %31 = arith.mulf %28, %1 : vector<1x128xf32>
    %32 = vector.broadcast %31 : vector<1x128xf32> to vector<8x128xf32>
    %33 = arith.mulf %30, %32 : vector<8x128xf32>
    %34 = vector.broadcast %2 : vector<1x128xf32> to vector<8x128xf32>
    %35 = arith.addf %33, %34 : vector<8x128xf32>
    %36 = arith.truncf %35 : vector<8x128xf32> to vector<8x128xbf16>
    %c0_16 = arith.constant 0 : index
    %c0_17 = arith.constant 0 : index
    %37 = vector.load %arg2[%c0_16, %c0_17] : memref<128x128xbf16, #tpu.memory_space<vmem>>, vector<128x128xbf16>
    %cst_18 = arith.constant dense<0.000000e+00> : vector<8x128xf32>
    %38 = tpu.matmul %36, %37, %cst_18 {dimension_numbers = #tpu.dot_dimension_numbers<[1], [0], [0], [1], [0, 0, 1, 1], [], []>} : vector<8x128xbf16>, vector<128x128xbf16>, vector<8x128xf32> -> vector<8x128xf32>
    %39 = vector.broadcast %3 : vector<1x128xf32> to vector<8x128xf32>
    %40 = arith.addf %38, %39 : vector<8x128xf32>
    %cst_19 = arith.constant 0.000000e+00 : f32
    %41 = vector.broadcast %cst_19 : f32 to vector<8x128xf32>
    %42 = arith.maximumf %40, %41 : vector<8x128xf32>
    %43 = arith.truncf %42 : vector<8x128xf32> to vector<8x128xbf16>
    %c0_20 = arith.constant 0 : index
    %c0_21 = arith.constant 0 : index
    %44 = vector.load %arg3[%c0_20, %c0_21] : memref<128x128xbf16, #tpu.memory_space<vmem>>, vector<128x128xbf16>
    %cst_22 = arith.constant dense<0.000000e+00> : vector<8x128xf32>
    %45 = tpu.matmul %43, %44, %cst_22 {dimension_numbers = #tpu.dot_dimension_numbers<[1], [0], [0], [1], [0, 0, 1, 1], [], []>} : vector<8x128xbf16>, vector<128x128xbf16>, vector<8x128xf32> -> vector<8x128xf32>
    %46 = vector.broadcast %4 : vector<1x128xf32> to vector<8x128xf32>
    %47 = arith.addf %45, %46 : vector<8x128xf32>
    %48 = math.tanh %47 : vector<8x128xf32>
    %c0_23 = arith.constant 0 : index
    %c0_24 = arith.constant 0 : index
    %49 = vector.load %arg5[%c0_23, %c0_24] : memref<8x128xf32, #tpu.memory_space<vmem>>, vector<8x128xf32>
    tpu.vector_store %arg5[%c0_23, %c0_24], %48 {strides = array<i32>} : memref<8x128xf32, #tpu.memory_space<vmem>>, vector<8x128xf32>,
    return
  }
}

</mosaic_0001>

<bundles_post_ra>
// kernel: actor_forward.1
= control target key start
LH: loop header
LB: loop body
LE: loop exit
PB: predicated region body
PF: predicated region fallthrough
CT: control target
= control target key end

     0   :  { %10 = vsyncpa [#allocation3], 0  ;;  %s797_s0 = inlined_call_operand.vmem [shape: f32[8,128], index: 0, kind: input, shape index: {}]   ;;  %s798_s1 = inlined_call_operand.hbm [shape: bf16[128,128], index: 1, kind: input, shape index: {}]   ;;  %s799_s2 = inlined_call_operand.hbm [shape: bf16[128,128], index: 2, kind: input, shape index: {}]   ;;  %s800_s3 = inlined_call_operand.hbm [shape: bf16[128,128], index: 3, kind: input, shape index: {}]   ;;  %s801_s4 = inlined_call_operand.vmem [shape: f32[8,128], index: 4, kind: input, shape index: {}]   ;;  %s802_s5 = inlined_call_operand.vmem [shape: f32[8,128], index: 5, kind: output, shape index: {}]  }
   0x1   :  { %11 = vsyncpa [#allocation5], 0  ;;  %s657_s18 = smov [#allocation4]   ;;  %s658_s20 = smov [#allocation2]  }
   0x2   :  { %s31_s19 = sshll.u32 %s657_s18, 4  ;;  %s19_s21 = sshll.u32 %s658_s20, 4  ;;  %s32_s19 = int_to_ptr.vmem [resolvable:$true] %s31_s19  ;;  %s694_s21 = int_to_ptr.vmem [resolvable:$true] %s19_s21 }
   0x3   :  { %s587_s24 = scalar_lea.hbm %s799_s2, 1024 }
   0x4   :  { %p588_p0 = scmp.ne.s32.totalorder %s799_s2, %s587_s24  ;;  %p591_p1 = scmp.lt.u32.totalorder %s587_s24, %s799_s2 }
   0x6   :  { %p593_p2 = pnand %p591_p1, %p588_p0 }
   0x8   :  { %596 = shalt.err (!%p593_p2)
}
   0x9   :  { %s597_s29 = scalar_lea.vmem %s32_s19, 1024  ;;  %p602_p4 = scmp.lt.s32.totalorder %s32_s19, %s32_s19 }
   0xa   :  { %p598_p3 = scmp.ne.s32.totalorder %s32_s19, %s597_s29  ;;  %p603_p5 = scmp.lt.s32.totalorder %s597_s29, %s597_s29 }
   0xc   :  { %p604_p6 = por %p603_p5, %p602_p4 }
   0xe   :  { %p605_p7 = pnand %p604_p6, %p598_p3 }
  0x10   :  { %608 = shalt.err (!%p605_p7)
}
  0x11   :  { %s659_s30 = smov 64   ;;  %s660_s6 = smov 4  }
  0x12   :  { %37 = dma.hbm_to_vmem [thread:$0]  %s799_s2, 1024, %s32_s19, [#allocation5], %s659_s30, %s659_s30, %s660_s6  }
  0x13   :  { %s609_s11 = scalar_lea.hbm %s798_s1, 1024 }
  0x14   :  { %p610_p8 = scmp.ne.s32.totalorder %s798_s1, %s609_s11  ;;  %p613_p9 = scmp.lt.u32.totalorder %s609_s11, %s798_s1 }
  0x16   :  { %p615_p10 = pnand %p613_p9, %p610_p8 }
  0x18   :  { %618 = shalt.err (!%p615_p10)
}
  0x19   :  { %s619_s16 = scalar_lea.vmem %s694_s21, 1024  ;;  %p624_p12 = scmp.lt.s32.totalorder %s694_s21, %s694_s21 }
  0x1a   :  { %p620_p11 = scmp.ne.s32.totalorder %s694_s21, %s619_s16  ;;  %p625_p13 = scmp.lt.s32.totalorder %s619_s16, %s619_s16 }
  0x1c   :  { %p626_p0 = por %p625_p13, %p624_p12 }
  0x1e   :  { %p627_p1 = pnand %p626_p0, %p620_p11 }
  0x20   :  { %630 = shalt.err (!%p627_p1)
}
  0x21   :  { %25 = dma.hbm_to_vmem [thread:$0]  %s798_s1, 1024, %s694_s21, [#allocation3], %s659_s30, %s659_s30, %s660_s6  }
  0x22   :  { %s661_s18 = smov [#allocation6]   ;;  %s631_s23 = scalar_lea.hbm %s800_s3, 1024 }
  0x23   :  { %s43_s19 = sshll.u32 %s661_s18, 4  ;;  %p632_p2 = scmp.ne.s32.totalorder %s800_s3, %s631_s23  ;;  %s44_s19 = int_to_ptr.vmem [resolvable:$true] %s43_s19 }
  0x24   :  { %p635_p3 = scmp.lt.u32.totalorder %s631_s23, %s800_s3 }
  0x26   :  { %p637_p4 = pnand %p635_p3, %p632_p2 }
  0x28   :  { %640 = shalt.err (!%p637_p4)
}
  0x29   :  { %s641_s28 = scalar_lea.vmem %s44_s19, 1024  ;;  %p646_p6 = scmp.lt.s32.totalorder %s44_s19, %s44_s19 }
  0x2a   :  { %p642_p5 = scmp.ne.s32.totalorder %s44_s19, %s641_s28  ;;  %p647_p7 = scmp.lt.s32.totalorder %s641_s28, %s641_s28 }
  0x2c   :  { %p648_p8 = por %p647_p7, %p646_p6 }
  0x2e   :  { %p649_p9 = pnand %p648_p8, %p642_p5 }
  0x30   :  { %652 = shalt.err (!%p649_p9)
}
  0x31   :  { %49 = dma.hbm_to_vmem [thread:$0]  %s800_s3, 1024, %s44_s19, [#allocation5], %s659_s30, %s659_s30, %s660_s6  }
  0x32   :  { %653 = dma.done.wait [#allocation3], 1024  }
  0x33   :  { %654 = vsyncadd [#allocation3], 4294966272 }
  0x34   :  { %655 = dma.done.wait [#allocation5], 2048  }
  0x35   :  { %656 = vsyncadd [#allocation5], 4294965248  ;;  %v662_v0 = vmov 0.0   ;;  %vm663_vm0 = vmmov 0   ;;  %v559_v1 = vld [vmem:[#allocation2] sm:$0xff]   ;;  %v560_v2 = vld [vmem:[#allocation2 + $0x8] sm:$0xff]   ;;  %v200_v51 = vlaneseq }
  0x36   :  { %492 = vmatprep.subr.bf16.mxu0 %v662_v0  ;;  %508 = vmatprep.mubr.msk.bf16.mxu0 %vm663_vm0, %v662_v0  ;;  %v561_v3 = vld [vmem:[#allocation2 + $0x10] sm:$0xff]   ;;  %v562_v4 = vld [vmem:[#allocation2 + $0x18] sm:$0xff]   ;;  %v563_v5 = vld [vmem:[#allocation2 + $0x20] sm:$0xff]  }
  0x37   :  { %512 = vmatprep.subr.bf16.mxu1 %v662_v0  ;;  %528 = vmatprep.mubr.msk.bf16.mxu1 %vm663_vm0, %v662_v0  ;;  %v564_v6 = vld [vmem:[#allocation2 + $0x28] sm:$0xff]   ;;  %v565_v7 = vld [vmem:[#allocation2 + $0x30] sm:$0xff]   ;;  %v566_v8 = vld [vmem:[#allocation2 + $0x38] sm:$0xff]   ;;  %v201_v52 = vshrl.u32 %v200_v51, 7 }
  0x38   :  { %493 = vmatpush3.bf16.msra.mxu0 %v559_v1  ;;  %v67_v9 = vld [vmem:[%s797_s0] sm:$0xff]  ;;  %v568_v12 = vld [vmem:[#allocation4 + $0x8] sm:$0xff]   ;;  %v569_v13 = vld [vmem:[#allocation4 + $0x10] sm:$0xff]  }
  0x39   :  { %494 = vmatprep.subr.bf16.mxu0 %v662_v0  ;;  %v68_v10 = vpack.c.bf16 %v67_v9, %v67_v9  ;;  %v567_v11 = vld [vmem:[#allocation4] sm:$0xff]   ;;  %v570_v14 = vld [vmem:[#allocation4 + $0x18] sm:$0xff]   ;;  %v572_v16 = vld [vmem:[#allocation4 + $0x28] sm:$0xff]   ;;  %v202_v54 = vsub.s32 0, %v201_v52 }
  0x3a   :  { %513 = vmatpush3.bf16.msra.mxu1 %v567_v11  ;;  %v571_v15 = vld [vmem:[#allocation4 + $0x20] sm:$0xff]   ;;  %v573_v17 = vld [vmem:[#allocation4 + $0x30] sm:$0xff]   ;;  %v574_v18 = vld [vmem:[#allocation4 + $0x38] sm:$0xff]  }
  0x3b   :  { %514 = vmatprep.subr.bf16.mxu1 %v662_v0  ;;  %v575_v19 = vld [vmem:[#allocation6] sm:$0xff]   ;;  %v576_v20 = vld [vmem:[#allocation6 + $0x8] sm:$0xff]   ;;  %v577_v21 = vld [vmem:[#allocation6 + $0x10] sm:$0xff]  }
  0x3c   :  { %495 = vmatpush3.bf16.msra.mxu0 %v560_v2  ;;  %v578_v22 = vld [vmem:[#allocation6 + $0x18] sm:$0xff]   ;;  %v579_v23 = vld [vmem:[#allocation6 + $0x20] sm:$0xff]   ;;  %v580_v24 = vld [vmem:[#allocation6 + $0x28] sm:$0xff]  }
  0x3d   :  { %496 = vmatprep.subr.bf16.mxu0 %v662_v0  ;;  %v437_v25 = vld [vmem:[%s801_s4] ss:$0 sm:$0xff]  ;;  %v63_v53 = vld [vmem:[%s801_s4 + $0x1] sm:$0x1]  ;;  %v446_v59 = vld [vmem:[%s801_s4 + $0x2] ss:$0 sm:$0xff] }
  0x3e   :  { %515 = vmatpush3.bf16.msra.mxu1 %v568_v12  ;;  %v581_v63 = vld [vmem:[#allocation6 + $0x30] sm:$0xff]   ;;  %v582_v1 = vld [vmem:[#allocation6 + $0x38] sm:$0xff]   ;;  %v447_v2 = vld [vmem:[%s801_s4 + $0x3] ss:$0 sm:$0xff] }
  0x3f   :  { %516 = vmatprep.subr.bf16.mxu1 %v662_v0 }
  0x40   :  { %497 = vmatpush3.bf16.msra.mxu0 %v561_v3 }
  0x41   :  { %498 = vmatprep.subr.bf16.mxu0 %v662_v0 }
  0x42   :  { %517 = vmatpush3.bf16.msra.mxu1 %v569_v13 }
  0x43   :  { %518 = vmatprep.subr.bf16.mxu1 %v662_v0 }
  0x44   :  { %499 = vmatpush3.bf16.msra.mxu0 %v562_v4 }
  0x45   :  { %500 = vmatprep.subr.bf16.mxu0 %v662_v0 }
  0x46   :  { %519 = vmatpush3.bf16.msra.mxu1 %v570_v14 }
  0x47   :  { %520 = vmatprep.subr.bf16.mxu1 %v662_v0 }
  0x48   :  { %501 = vmatpush3.bf16.msra.mxu0 %v563_v5 }
  0x49   :  { %502 = vmatprep.subr.bf16.mxu0 %v662_v0 }
  0x4a   :  { %521 = vmatpush3.bf16.msra.mxu1 %v571_v15 }
  0x4b   :  { %522 = vmatprep.subr.bf16.mxu1 %v662_v0 }
  0x4c   :  { %503 = vmatpush3.bf16.msra.mxu0 %v564_v6 }
  0x4d   :  { %504 = vmatprep.subr.bf16.mxu0 %v662_v0 }
  0x4e   :  { %523 = vmatpush3.bf16.msra.mxu1 %v572_v16 }
  0x4f   :  { %524 = vmatprep.subr.bf16.mxu1 %v662_v0 }
  0x50   :  { %505 = vmatpush3.bf16.msra.mxu0 %v565_v7 }
  0x51   :  { %506 = vmatprep.subr.bf16.mxu0 %v662_v0 }
  0x52   :  { %525 = vmatpush3.bf16.msra.mxu1 %v573_v17 }
  0x53   :  { %526 = vmatprep.subr.bf16.mxu1 %v662_v0 }
  0x54   :  { %507 = vmatpush3.bf16.msra.mxu0 %v566_v8 }
  0x55   :  { %532 = vmatprep.subr.bf16.mxu0 %v662_v0 }
  0x56   :  { %527 = vmatpush3.bf16.msra.mxu1 %v574_v18 }
  0x57   :  { %509 = vmatmul.mubr.bf16.vlgmr.msra.gmra.mrb[0].mxu0 %v68_v10  ;;  %v456_v10 = vld [vmem:[%s801_s4 + $0x4] ss:$0 sm:$0xff] }
  0x58   :  { %548 = vmatprep.mubr.msk.bf16.mxu0 %vm663_vm0, %v662_v0  ;;  %533 = vmatpush3.bf16.msra.mxu0 %v575_v19 }
  0x59   :  { %534 = vmatprep.subr.bf16.mxu0 %v662_v0 }
  0x5c   :  { %535 = vmatpush3.bf16.msra.mxu0 %v576_v20 }
  0x5d   :  { %536 = vmatprep.subr.bf16.mxu0 %v662_v0 }
  0x60   :  { %537 = vmatpush3.bf16.msra.mxu0 %v577_v21 }
  0x61   :  { %538 = vmatprep.subr.bf16.mxu0 %v662_v0 }
  0x64   :  { %539 = vmatpush3.bf16.msra.mxu0 %v578_v22 }
  0x65   :  { %540 = vmatprep.subr.bf16.mxu0 %v662_v0 }
  0x68   :  { %541 = vmatpush3.bf16.msra.mxu0 %v579_v23 }
  0x69   :  { %542 = vmatprep.subr.bf16.mxu0 %v662_v0 }
  0x6c   :  { %543 = vmatpush3.bf16.msra.mxu0 %v580_v24 }
  0x6d   :  { %544 = vmatprep.subr.bf16.mxu0 %v662_v0 }
  0x70   :  { %545 = vmatpush3.bf16.msra.mxu0 %v581_v63 }
  0x71   :  { %546 = vmatprep.subr.bf16.mxu0 %v662_v0 }
  0x74   :  { %547 = vmatpush3.bf16.msra.mxu0 %v582_v1 }
 0x12a   :  { %v171_v26 = vpop.f32.mrb[0].mxu0 }
 0x12b   :  { %v172_v27 = vadd.f32 %v437_v25, %v171_v26  ;;  %v510_v28 = vpop.f32.mrb[1].mxu0 }
 0x12c   :  { %v174_v29 = vpop.f32.mrb[2].mxu0 }
 0x12d   :  { %v177_v30 = vmax.f32 %v172_v27, 0.0  ;;  %v511_v31 = vpop.f32.mrb[3].mxu0 }
 0x12f   :  { %v178_v32 = vrot.slane %v177_v30, 4  ;;  %v184_v33 = vmul.f32 %v177_v30, %v177_v30 }
 0x131   :  { %v179_v34 = vadd.f32 %v178_v32, %v177_v30  ;;  %v185_v35 = vrot.slane %v184_v33, 4 }
 0x133   :  { %v180_v36 = vrot.slane %v179_v34, 2  ;;  %v186_v37 = vadd.f32 %v185_v35, %v184_v33 }
 0x135   :  { %v181_v38 = vadd.f32 %v180_v36, %v179_v34  ;;  %v187_v39 = vrot.slane %v186_v37, 2 }
 0x137   :  { %v188_v40 = vadd.f32 %v187_v39, %v186_v37  ;;  %v182_v41 = vrot.slane %v181_v38, 1 }
 0x139   :  { %v189_v42 = vrot.slane %v188_v40, 1  ;;  %v183_v43 = vadd.f32 %v182_v41, %v181_v38 }
 0x13b   :  { %v190_v44 = vadd.f32 %v189_v42, %v188_v40  ;;  %v191_v45 = vmul.f32 0.125, %v183_v43 }
 0x13d   :  { %v192_v46 = vmul.f32 0.125, %v190_v44  ;;  %v193_v47 = vmul.f32 %v191_v45, %v191_v45  ;;  %v198_v57 = vsub.f32 %v177_v30, %v191_v45 }
 0x13f   :  { %v194_v48 = vsub.f32 %v192_v46, %v193_v47 }
 0x141   :  { %v195_v49 = vmax.f32 %v194_v48, 0.0 }
 0x143   :  { %v196_v50 = vadd.f32 1e-05, %v195_v49 }
 0x145   :  { %583 = vrsqrt.f32 %v196_v50 }
 0x14f   :  { %v584_v55 = vpop.eup %583 }
 0x150   :  { %v199_v56 = vmul.f32 %v584_v55, %v63_v53 }
 0x152   :  { %v203_v58 = vrot.slane %v199_v56, %v202_v54 }
 0x154   :  { %v204_v60 = vmul.f32 %v203_v58, %v198_v57 }
 0x156   :  { %v209_v61 = vadd.f32 %v446_v59, %v204_v60 }
 0x158   :  { %v210_v62 = vpack.c.bf16 %v209_v61, %v209_v61 }
 0x15a   :  { %529 = vmatmul.mubr.bf16.vlgmr.msra.gmra.mrb[0].mxu1 %v210_v62 }
 0x22d   :  { %v313_v3 = vpop.f32.mrb[0].mxu1 }
 0x22e   :  { %v314_v4 = vadd.f32 %v447_v2, %v313_v3  ;;  %v530_v5 = vpop.f32.mrb[1].mxu1 }
 0x22f   :  { %v316_v6 = vpop.f32.mrb[2].mxu1 }
 0x230   :  { %v319_v7 = vmax.f32 %v314_v4, 0.0  ;;  %v531_v8 = vpop.f32.mrb[3].mxu1 }
 0x232   :  { %v320_v9 = vpack.c.bf16 %v319_v7, %v319_v7 }
 0x234   :  { %549 = vmatmul.mubr.bf16.vlgmr.msra.gmra.mrb[4].mxu0 %v320_v9 }
 0x307   :  { %v423_v11 = vpop.f32.mrb[4].mxu0 }
 0x308   :  { %v424_v0 = vadd.f32 %v456_v10, %v423_v11  ;;  %v550_v12 = vpop.f32.mrb[5].mxu0 }
 0x309   :  { %v426_v13 = vpop.f32.mrb[6].mxu0 }
 0x30a   :  { %585 = vtanh.f32 %v424_v0  ;;  %v551_v14 = vpop.f32.mrb[7].mxu0 }
 0x314   :  { %v586_v15 = vpop.eup %585 }
 0x315   :  { %430 = vst [vmem:[%s802_s5] sm:$0xff] %v586_v15 }
 0x316   :  { %435 = vsyncpa [#allocation3], 1 }
 0x317   :  { %436 = vsyncpa [#allocation5], 1 }

</bundles_post_ra>
